<compile_context>
chip_gen: v6e
topology: v6e:2x2x1
jax: 0.10.0
libtpu: 0.0.40
codegen_flags: <defaults>
</compile_context>

<pallas_src>
import jax
import jax.numpy as jnp
from jax.experimental import pallas as pl
from jax.experimental.pallas import tpu as pltpu

_MIB = 1 << 20


def _round_up(v, m):
    return -(-v // m) * m


def _round_down(v, m):
    return (v // m) * m


def _vmem_limit_bytes():
    """Per-generation scoped-VMEM limit: physical capacity minus headroom.
    v5e/v6e (128 MiB physical) -> 112 MiB; v7x (64 MiB per TC) -> 48 MiB.
    Falls back to the conservative v7x figure if the query is unavailable."""
    cap = 64 * _MIB
    try:
        cap = int(pltpu.get_tpu_info().vmem_capacity_bytes)
    except Exception:
        pass
    cap = min(max(cap, 32 * _MIB), 128 * _MIB)
    return min(cap - 16 * _MIB, 112 * _MIB)


def _pick_rows(B, bytes_per_row, budget_bytes, align):
    """Bag rows per grid step: `align`-multiple, double-buffered within budget,
    split into >=2 tiles when B allows so both v7x TensorCores get bag tiles."""
    cap = _round_down(budget_bytes // (2 * bytes_per_row), align)
    if cap < align:
        raise ValueError("a single row tile does not fit the VMEM budget")
    rows = min(_round_up(B, align), cap)
    if B > align and rows >= _round_up(B, align):
        rows = max(align, _round_up(-(-B // 2), align))   # >=2 tiles for megacore
    return rows


# ---------------------------------------------------------------------------
# Kernels
# ---------------------------------------------------------------------------
def _folded_kernel(x_ref, w_ref, b_ref, o_ref):
    """Lane-dense fast path: y = x2d @ W_big + bc.
    W_big is the classifier weight tiled N times along rows, so one MXU matmul
    performs both the per-bag instance sum and the classifier."""
    y = jnp.dot(x_ref[...], w_ref[...], preferred_element_type=jnp.float32)
    o_ref[...] = (y + b_ref[...]).astype(o_ref.dtype)


def _chunked_kernel(x_ref, wc_ref, bc_ref, o_ref, acc_ref):
    """Fast path for large bags: accumulate sum_n H over instance chunks
    (last grid axis, 'arbitrary') in an f32 VMEM scratch, classify at the end."""
    k = pl.program_id(1)

    @pl.when(k == 0)
    def _():
        acc_ref[...] = jnp.zeros_like(acc_ref)

    acc_ref[...] += jnp.sum(x_ref[...].astype(jnp.float32), axis=1)

    @pl.when(k == pl.num_programs(1) - 1)
    def _():
        y = jnp.dot(acc_ref[...], wc_ref[...], preferred_element_type=jnp.float32)
        o_ref[...] = (y + bc_ref[...]).astype(o_ref.dtype)


def _full_kernel(x_ref, w1_ref, b1_ref, w2_ref, b2_ref, wc_ref, bc_ref, o_ref):
    """Full-fidelity path: every op of the PyTorch forward.  N is padded to a
    sublane multiple in the wrapper so the reshapes are layout-preserving."""
    TB, NP, L = x_ref.shape
    H = x_ref[...].astype(jnp.float32)                                   # (TB, NP, L)
    Hf = H.reshape(TB * NP, L)

    hid = jnp.tanh(
        jnp.dot(Hf, w1_ref[...], preferred_element_type=jnp.float32) + b1_ref[...])
    a = jnp.dot(hid, w2_ref[...], preferred_element_type=jnp.float32) + b2_ref[...]
    # torch: transpose then softmax(dim=1) == softmax over the size-1 K axis -> ones.
    A = jax.nn.softmax(a, axis=-1)                                       # (TB*NP, 1)

    M = jnp.sum(A.reshape(TB, NP, 1) * H, axis=1)                        # (TB, L)
    y = jnp.dot(M, wc_ref[...], preferred_element_type=jnp.float32) + bc_ref[...]
    o_ref[...] = y.astype(o_ref.dtype)


# ---------------------------------------------------------------------------
# Wrapper
# ---------------------------------------------------------------------------
def attention_mil(x, params, *, skip_dead_attention=True, use_bf16=False,
                  force_chunked=False, interpret=False):
    """x: (B, N, L) -> (B, num_classes) float32.
    Matches PyTorch AttentionMIL.forward (probs.squeeze(1)).

    skip_dead_attention=True exploits softmax-over-a-size-1-axis == 1 (so
    M == sum_n H) and skips the numerically dead attention MLP; =False runs
    every op of the module.  use_bf16=True streams x in bf16 (f32 accumulate).
    """
    B, N, L = x.shape
    w1, b1, w2, b2, wc, bc = params
    C = wc.shape[1]
    out_dtype = jnp.float32

    vmem_limit = _vmem_limit_bytes()
    budget = vmem_limit - 8 * _MIB          # slack for Mosaic-internal scratch

    c_pad = _round_up(C, 128)
    wc_p = jnp.pad(wc, ((0, 0), (0, c_pad - C))).astype(jnp.float32)
    bc_p = jnp.pad(bc, ((0, 0), (0, c_pad - C))).astype(jnp.float32)

    if use_bf16:
        x = x.astype(jnp.bfloat16)
    itemsize = x.dtype.itemsize
    align = 16 if itemsize < 4 else 8       # sublane packing: 16 rows for 16-bit
    l_pad = _round_up(L, 128)

    # -------------------- full-fidelity path --------------------
    if not skip_dead_attention:
        # TODO(synk): the full path keeps a whole bag per block; for very large
        # bags use the chunked fast path (the attention branch is dead anyway).
        n_pad = _round_up(N, align)
        if n_pad != N:
            x = jnp.pad(x, ((0, 0), (0, n_pad - N), (0, 0)))   # zero rows add 0 to M
        per_row = n_pad * (l_pad + 256) * 4 + 2 * c_pad * 4    # x + hid/a intermediates
        tb = _pick_rows(B, per_row, min(vmem_limit, 64 * _MIB) // 2, align)
        b_pad = _round_up(B, tb)
        if b_pad != B:
            x = jnp.pad(x, ((0, b_pad - B), (0, 0), (0, 0)))
        const = lambda i: (0, 0)
        out = pl.pallas_call(
            _full_kernel,
            out_shape=jax.ShapeDtypeStruct((b_pad, c_pad), out_dtype),
            grid_spec=pltpu.PrefetchScalarGridSpec(
                num_scalar_prefetch=0,
                grid=(b_pad // tb,),
                in_specs=[
                    pl.BlockSpec((tb, n_pad, L), lambda i: (i, 0, 0)),
                    pl.BlockSpec(w1.shape, const),
                    pl.BlockSpec(b1.shape, const),
                    pl.BlockSpec(w2.shape, const),
                    pl.BlockSpec(b2.shape, const),
                    pl.BlockSpec(wc_p.shape, const),
                    pl.BlockSpec(bc_p.shape, const),
                ],
                out_specs=pl.BlockSpec((tb, c_pad), lambda i: (i, 0)),
            ),
            compiler_params=pltpu.CompilerParams(
                dimension_semantics=("parallel",),
                vmem_limit_bytes=vmem_limit,
            ),
            interpret=interpret,
        )(x, w1, b1, w2, b2, wc_p, bc_p)
        return out[:B, :C]

    # -------------------- fast path --------------------
    nl = N * L
    nl_pad = _round_up(nl, 128)
    wbig_bytes = nl_pad * c_pad * 4
    use_folded = (
        not force_chunked
        and 2 * wbig_bytes <= budget // 2
        and 2 * align * (nl_pad * itemsize + c_pad * 4) <= budget - 2 * wbig_bytes
    )

    if use_folded:
        # Fold the per-bag instance sum into the classifier matmul:
        #   y[b] = concat_n(H[b, n, :]) @ tile(wc, N) + bc
        w_big = jnp.tile(wc_p, (N, 1))                               # (N*L, c_pad)
        if nl_pad != nl:
            w_big = jnp.pad(w_big, ((0, nl_pad - nl), (0, 0)))
        if itemsize < 4:
            w_big = w_big.astype(x.dtype)                            # bf16 MXU operands
        x2d = x.reshape(B, nl)
        if nl_pad != nl:
            x2d = jnp.pad(x2d, ((0, 0), (0, nl_pad - nl)))
        wbig_resident = 2 * w_big.size * w_big.dtype.itemsize        # double-buffered
        per_row = nl_pad * itemsize + c_pad * 4                      # x row + f32 out row
        tb = _pick_rows(B, per_row, budget - wbig_resident, align)
        b_pad = _round_up(B, tb)
        if b_pad != B:
            x2d = jnp.pad(x2d, ((0, b_pad - B), (0, 0)))
        const = lambda i: (0, 0)
        out = pl.pallas_call(
            _folded_kernel,
            out_shape=jax.ShapeDtypeStruct((b_pad, c_pad), out_dtype),
            grid_spec=pltpu.PrefetchScalarGridSpec(
                num_scalar_prefetch=0,
                grid=(b_pad // tb,),
                in_specs=[
                    pl.BlockSpec((tb, nl_pad), lambda i: (i, 0)),
                    pl.BlockSpec(w_big.shape, const),    # resident across grid steps
                    pl.BlockSpec(bc_p.shape, const),
                ],
                out_specs=pl.BlockSpec((tb, c_pad), lambda i: (i, 0)),
            ),
            compiler_params=pltpu.CompilerParams(
                dimension_semantics=("parallel",),       # both v7x TCs get bag tiles
                vmem_limit_bytes=vmem_limit,
            ),
            interpret=interpret,
        )(x2d, w_big, bc_p)
        return out[:B, :C]

    # Chunked-accumulator fast path (bags too large to fold / fit whole).
    n_full = _round_up(N, align)
    bag_bytes = n_full * l_pad * itemsize                            # padded VMEM footprint
    per_row_full = bag_bytes + c_pad * 4
    if 2 * align * per_row_full <= budget:
        n_chunk = n_full
        tb = _pick_rows(B, per_row_full, budget, align)
    else:
        tb = align
        n_chunk = _round_down(budget // (2 * tb * l_pad * itemsize), align)
        n_chunk = max(align, min(n_chunk, n_full))
        if 2 * tb * n_chunk * l_pad * itemsize > budget:
            raise ValueError("instance chunk does not fit the VMEM budget")
    n_pad = _round_up(N, n_chunk)
    b_pad = _round_up(B, tb)
    x = jnp.pad(x, ((0, b_pad - B), (0, n_pad - N), (0, 0)))         # zero rows add 0
    const2 = lambda i, k: (0, 0)
    out = pl.pallas_call(
        _chunked_kernel,
        out_shape=jax.ShapeDtypeStruct((b_pad, c_pad), out_dtype),
        grid_spec=pltpu.PrefetchScalarGridSpec(
            num_scalar_prefetch=0,
            grid=(b_pad // tb, n_pad // n_chunk),
            in_specs=[
                pl.BlockSpec((tb, n_chunk, L), lambda i, k: (i, k, 0)),
                pl.BlockSpec(wc_p.shape, const2),
                pl.BlockSpec(bc_p.shape, const2),
            ],
            out_specs=pl.BlockSpec((tb, c_pad), lambda i, k: (i, 0)),
            scratch_shapes=[pltpu.VMEM((tb, L), jnp.float32)],
        ),
        compiler_params=pltpu.CompilerParams(
            dimension_semantics=("parallel", "arbitrary"),
            vmem_limit_bytes=vmem_limit,
        ),
        interpret=interpret,
    )(x, wc_p, bc_p)
    return out[:B, :C]


# ---------------------------------------------------------------------------
# Params / reference
# ---------------------------------------------------------------------------
def init_params(key, input_dim, num_classes, D=128, K=1):
    """Deterministic synthetic params, stored pre-transposed so kernels do x @ W.
    PyTorch shapes: attention[0].weight (D, L), attention[2].weight (K, D),
    classifier[0].weight (C, L*K)."""
    L, C = input_dim, num_classes
    ks = jax.random.split(key, 6)
    w1 = jax.random.normal(ks[0], (L, D), jnp.float32) * 0.05
    b1 = jax.random.normal(ks[1], (1, D), jnp.float32) * 0.05
    w2 = jax.random.normal(ks[2], (D, K), jnp.float32) * 0.05
    b2 = jax.random.normal(ks[3], (1, K), jnp.float32) * 0.05
    wc = jax.random.normal(ks[4], (L * K, C), jnp.float32) * 0.05
    bc = jax.random.normal(ks[5], (1, C), jnp.float32) * 0.05
    return (w1, b1, w2, b2, wc, bc)


def attention_mil_reference(x, params):
    """Pure-JAX reference mirroring the PyTorch forward exactly."""
    w1, b1, w2, b2, wc, bc = params
    H = x
    A = jnp.tanh(H @ w1 + b1) @ w2 + b2          # (B, N, 1)
    A = jnp.transpose(A, (0, 2, 1))              # (B, 1, N)
    A = jax.nn.softmax(A, axis=1)                # softmax over size-1 axis -> ones
    M = A @ H                                    # (B, 1, L)
    Y = M @ wc + bc                              # (B, 1, C)
    return Y[:, 0, :]                            # torch probs.squeeze(1)


if __name__ == "__main__":
    B, N, L, C = 2, 8, 32, 4   # 2 bags, 8 instances each, input_dim=32, 4 classes

    key = jax.random.PRNGKey(0)
    k_x, k_p = jax.random.split(key)
    x = jax.random.normal(k_x, (B, N, L), jnp.float32)
    params = init_params(k_p, input_dim=L, num_classes=C)

    y_ref = attention_mil_reference(x, params)

    y_folded = jax.block_until_ready(attention_mil(x, params))
    y_chunked = jax.block_until_ready(attention_mil(x, params, force_chunked=True))
    y_full = jax.block_until_ready(attention_mil(x, params, skip_dead_attention=False))
    y_bf16 = jax.block_until_ready(attention_mil(x, params, use_bf16=True))

    for name, y, tol in (("folded", y_folded, 2e-3),
                         ("chunked", y_chunked, 2e-3),
                         ("full", y_full, 2e-3),
                         ("bf16", y_bf16, 5e-2)):
        assert y.shape == (B, C), (name, y.shape)
        assert jnp.allclose(y, y_ref, atol=tol, rtol=tol), (name, y, y_ref)

    print("KERNEL_OK")
</pallas_src>

<mosaic_0001>
module attributes {stable_mosaic.version = 11 : i64} {
  func.func @_folded_kernel(%arg0: i32, %arg1: memref<8x256xf32, #tpu.memory_space<vmem>>, %arg2: memref<256x128xf32, #tpu.memory_space<vmem>>, %arg3: memref<1x128xf32, #tpu.memory_space<vmem>>, %arg4: memref<8x128xf32, #tpu.memory_space<vmem>>) attributes {dimension_semantics = [#tpu.dimension_semantics<parallel>], iteration_bounds = array<i64: 1>, scalar_prefetch = 0 : i64, scratch_operands = 0 : i64, tpu.core_type = #tpu.core_type<tc>, window_params = [{transform_indices = @transform_0, window_bounds = array<i64: 8, 256>}, {pipeline_mode = #tpu.pipeline_mode<synchronous>, transform_indices = @transform_1, window_bounds = array<i64: 256, 128>}, {pipeline_mode = #tpu.pipeline_mode<synchronous>, transform_indices = @transform_2, window_bounds = array<i64: 1, 128>}, {transform_indices = @transform_3, window_bounds = array<i64: 8, 128>}]} {
    %c0 = arith.constant 0 : index
    %c0_0 = arith.constant 0 : index
    %0 = vector.load %arg1[%c0, %c0_0] : memref<8x256xf32, #tpu.memory_space<vmem>>, vector<8x256xf32>
    %c0_1 = arith.constant 0 : index
    %c0_2 = arith.constant 0 : index
    %1 = vector.load %arg2[%c0_1, %c0_2] : memref<256x128xf32, #tpu.memory_space<vmem>>, vector<256x128xf32>
    %cst = arith.constant dense<0.000000e+00> : vector<8x128xf32>
    %2 = tpu.matmul %0, %1, %cst {dimension_numbers = #tpu.dot_dimension_numbers<[1], [0], [0], [1], [0, 0, 1, 1], [], []>} : vector<8x256xf32>, vector<256x128xf32>, vector<8x128xf32> -> vector<8x128xf32>
    %c0_3 = arith.constant 0 : index
    %c0_4 = arith.constant 0 : index
    %3 = vector.load %arg3[%c0_3, %c0_4] : memref<1x128xf32, #tpu.memory_space<vmem>>, vector<1x128xf32>
    %4 = vector.broadcast %3 : vector<1x128xf32> to vector<8x128xf32>
    %5 = arith.addf %2, %4 : vector<8x128xf32>
    %c0_5 = arith.constant 0 : index
    %c0_6 = arith.constant 0 : index
    %6 = vector.load %arg4[%c0_5, %c0_6] : memref<8x128xf32, #tpu.memory_space<vmem>>, vector<8x128xf32>
    tpu.vector_store %arg4[%c0_5, %c0_6], %5 {strides = array<i32>} : memref<8x128xf32, #tpu.memory_space<vmem>>, vector<8x128xf32>,
    return
  }
  func.func @transform_0(%arg0: i32) -> (i32, i32) {
    %c0_i32 = arith.constant 0 : i32
    %c0_i32_0 = arith.constant 0 : i32
    return %arg0, %c0_i32 : i32, i32
  }
  func.func @transform_1(%arg0: i32) -> (i32, i32) {
    %c0_i32 = arith.constant 0 : i32
    %c0_i32_0 = arith.constant 0 : i32
    %c0_i32_1 = arith.constant 0 : i32
    return %c0_i32, %c0_i32_0 : i32, i32
  }
  func.func @transform_2(%arg0: i32) -> (i32, i32) {
    %c0_i32 = arith.constant 0 : i32
    %c0_i32_0 = arith.constant 0 : i32
    %c0_i32_1 = arith.constant 0 : i32
    return %c0_i32, %c0_i32_0 : i32, i32
  }
  func.func @transform_3(%arg0: i32) -> (i32, i32) {
    %c0_i32 = arith.constant 0 : i32
    %c0_i32_0 = arith.constant 0 : i32
    return %arg0, %c0_i32 : i32, i32
  }
}

</mosaic_0001>

<bundles_post_ra>
// kernel: tpu_custom_call.1
= control target key start
LH: loop header
LB: loop body
LE: loop exit
PB: predicated region body
PF: predicated region fallthrough
CT: control target
= control target key end

     0   :  { %8 = vsyncpa [#allocation3], 0  ;;  %s313_s0 = inlined_call_operand.hbm [shape: f32[8,256], index: 0, kind: input, shape index: {}]   ;;  %s314_s1 = inlined_call_operand.hbm [shape: f32[256,128], index: 1, kind: input, shape index: {}]   ;;  %s315_s2 = inlined_call_operand.vmem [shape: f32[1,128], index: 2, kind: input, shape index: {}]   ;;  %s316_s3 = inlined_call_operand.hbm [shape: f32[8,128], index: 3, kind: output, shape index: {}]  }
   0x1   :  { %9 = vsyncpa [#allocation6], 0 }
   0x2   :  { %10 = vsyncpa [#allocation4], 0  ;;  %s276_s12 = smov [#allocation2]   ;;  %s277_s14 = smov [#allocation5]  }
   0x3   :  { %s17_s13 = sshll.u32 %s276_s12, 4  ;;  %s26_s15 = sshll.u32 %s277_s14, 4  ;;  %s18_s13 = int_to_ptr.vmem [resolvable:$true] %s17_s13  ;;  %s27_s15 = int_to_ptr.vmem [resolvable:$true] %s26_s15 }
   0x4   :  { %s218_s16 = scalar_lea.vmem %s18_s13, 256  ;;  %p223_p1 = scmp.lt.s32.totalorder %s18_s13, %s18_s13 }
   0x5   :  { %p219_p0 = scmp.ne.s32.totalorder %s18_s13, %s218_s16  ;;  %p224_p2 = scmp.lt.s32.totalorder %s218_s16, %s218_s16 }
   0x7   :  { %p225_p3 = por %p224_p2, %p223_p1 }
   0x9   :  { %p226_p4 = pnand %p225_p3, %p219_p0 }
   0xb   :  { %229 = shalt.err (!%p226_p4)
}
   0xc   :  { %20 = dma.hbm_to_vmem [thread:$0]  %s313_s0, 256, %s18_s13, [#allocation3]  }
   0xd   :  { %s238_s19 = scalar_lea.vmem %s27_s15, 4096  ;;  %p243_p6 = scmp.lt.s32.totalorder %s27_s15, %s27_s15 }
   0xe   :  { %p239_p5 = scmp.ne.s32.totalorder %s27_s15, %s238_s19  ;;  %p244_p7 = scmp.lt.s32.totalorder %s238_s19, %s238_s19 }
  0x10   :  { %p245_p8 = por %p244_p7, %p243_p6 }
  0x12   :  { %p246_p9 = pnand %p245_p8, %p239_p5 }
  0x14   :  { %249 = shalt.err (!%p246_p9)
}
  0x15   :  { %s278_s20 = smov 128   ;;  %s279_s21 = smov 8  }
  0x16   :  { %32 = dma.hbm_to_vmem [thread:$0]  %s314_s1, 4096, %s27_s15, [#allocation6], %s278_s20, %s278_s20, %s279_s21  }
  0x17   :  { %270 = dma.done.wait [#allocation3], 256  }
  0x18   :  { %271 = vsyncadd [#allocation3], 4294967040 }
  0x19   :  { %272 = dma.done.wait [#allocation6], 4096  }
  0x1a   :  { %273 = vsyncadd [#allocation6], 4294963200  ;;  %v74_v0 = vld [vmem:[#allocation5 + $0xf8] sm:$0xff]  ;;  %v73_v2 = vld [vmem:[#allocation5 + $0xf0] sm:$0xff]  ;;  %s280_s24 = smov [#allocation7]  }
  0x1b   :  { %v58_v1 = vld [vmem:[#allocation5 + $0x78] sm:$0xff]  ;;  %170 = vmatprep.subr.mxu0 %v74_v0  ;;  %v57_v3 = vld [vmem:[#allocation5 + $0x70] sm:$0xff]  ;;  %v72_v4 = vld [vmem:[#allocation5 + $0xe8] sm:$0xff]  ;;  %s159_s25 = sshll.u32 %s280_s24, 4  ;;  %s160_s25 = int_to_ptr.vmem [resolvable:$true] %s159_s25 }
  0x1c   :  { %171 = vmatpush3.msra.mxu0 %v58_v1  ;;  %v56_v5 = vld [vmem:[#allocation5 + $0x68] sm:$0xff]  ;;  %v71_v6 = vld [vmem:[#allocation5 + $0xe0] sm:$0xff]  ;;  %v70_v8 = vld [vmem:[#allocation5 + $0xd8] sm:$0xff]  ;;  %s250_s26 = scalar_lea.vmem %s160_s25, 128  ;;  %p255_p11 = scmp.lt.s32.totalorder %s160_s25, %s160_s25 }
  0x1d   :  { %172 = vmatprep.subr.mxu0 %v73_v2  ;;  %v55_v7 = vld [vmem:[#allocation5 + $0x60] sm:$0xff]  ;;  %v54_v9 = vld [vmem:[#allocation5 + $0x58] sm:$0xff]  ;;  %v69_v10 = vld [vmem:[#allocation5 + $0xd0] sm:$0xff]  ;;  %p251_p10 = scmp.ne.s32.totalorder %s160_s25, %s250_s26  ;;  %p256_p12 = scmp.lt.s32.totalorder %s250_s26, %s250_s26 }
  0x1e   :  { %173 = vmatpush3.msra.mxu0 %v57_v3  ;;  %v53_v11 = vld [vmem:[#allocation5 + $0x50] sm:$0xff]  ;;  %v68_v12 = vld [vmem:[#allocation5 + $0xc8] sm:$0xff]  ;;  %v42_v13 = vld [vmem:[#allocation2 + $0x8] sm:$0xff] }
  0x1f   :  { %174 = vmatprep.subr.mxu0 %v72_v4  ;;  %v52_v14 = vld [vmem:[#allocation5 + $0x48] sm:$0xff]  ;;  %146 = vmatprep.mubr.f32.mxu0 %v42_v13  ;;  %v67_v15 = vld [vmem:[#allocation5 + $0xc0] sm:$0xff]  ;;  %v66_v17 = vld [vmem:[#allocation5 + $0xb8] sm:$0xff]  ;;  %p257_p13 = por %p256_p12, %p255_p11 }
  0x20   :  { %175 = vmatpush3.msra.mxu0 %v56_v5  ;;  %v51_v16 = vld [vmem:[#allocation5 + $0x40] sm:$0xff]  ;;  %v50_v18 = vld [vmem:[#allocation5 + $0x38] sm:$0xff]  ;;  %v65_v19 = vld [vmem:[#allocation5 + $0xb0] sm:$0xff] }
  0x21   :  { %176 = vmatprep.subr.mxu0 %v71_v6  ;;  %v49_v20 = vld [vmem:[#allocation5 + $0x30] sm:$0xff]  ;;  %v64_v21 = vld [vmem:[#allocation5 + $0xa8] sm:$0xff]  ;;  %v63_v23 = vld [vmem:[#allocation5 + $0xa0] sm:$0xff]  ;;  %p258_p0 = pnand %p257_p13, %p251_p10 }
  0x22   :  { %177 = vmatpush3.msra.mxu0 %v55_v7  ;;  %v48_v22 = vld [vmem:[#allocation5 + $0x28] sm:$0xff]  ;;  %v47_v24 = vld [vmem:[#allocation5 + $0x20] sm:$0xff]  ;;  %v62_v25 = vld [vmem:[#allocation5 + $0x98] sm:$0xff] }
  0x23   :  { %178 = vmatprep.subr.mxu0 %v70_v8  ;;  %v46_v26 = vld [vmem:[#allocation5 + $0x18] sm:$0xff]  ;;  %v61_v27 = vld [vmem:[#allocation5 + $0x90] sm:$0xff]  ;;  %v60_v29 = vld [vmem:[#allocation5 + $0x88] sm:$0xff] }
  0x24   :  { %179 = vmatpush3.msra.mxu0 %v54_v9  ;;  %v45_v28 = vld [vmem:[#allocation5 + $0x10] sm:$0xff]  ;;  %v44_v30 = vld [vmem:[#allocation5 + $0x8] sm:$0xff]  ;;  %v59_v31 = vld [vmem:[#allocation5 + $0x80] sm:$0xff] }
  0x25   :  { %180 = vmatprep.subr.mxu0 %v69_v10  ;;  %v43_v32 = vld [vmem:[#allocation5] sm:$0xff]  ;;  %v41_v33 = vld [vmem:[#allocation2] sm:$0xff] }
  0x26   :  { %181 = vmatpush3.msra.mxu0 %v53_v11  ;;  %v169_v35 = vld [vmem:[%s315_s2] ss:$0 sm:$0xff] }
  0x27   :  { %182 = vmatprep.subr.mxu0 %v68_v12 }
  0x28   :  { %183 = vmatpush3.msra.mxu0 %v52_v14 }
  0x29   :  { %184 = vmatprep.subr.mxu0 %v67_v15 }
  0x2a   :  { %185 = vmatpush3.msra.mxu0 %v51_v16 }
  0x2b   :  { %186 = vmatprep.subr.mxu0 %v66_v17 }
  0x2c   :  { %187 = vmatpush3.msra.mxu0 %v50_v18 }
  0x2d   :  { %188 = vmatprep.subr.mxu0 %v65_v19 }
  0x2e   :  { %189 = vmatpush3.msra.mxu0 %v49_v20 }
  0x2f   :  { %190 = vmatprep.subr.mxu0 %v64_v21 }
  0x30   :  { %191 = vmatpush3.msra.mxu0 %v48_v22 }
  0x31   :  { %192 = vmatprep.subr.mxu0 %v63_v23 }
  0x32   :  { %193 = vmatpush3.msra.mxu0 %v47_v24 }
  0x33   :  { %194 = vmatprep.subr.mxu0 %v62_v25 }
  0x34   :  { %195 = vmatpush3.msra.mxu0 %v46_v26 }
  0x35   :  { %196 = vmatprep.subr.mxu0 %v61_v27 }
  0x36   :  { %197 = vmatpush3.msra.mxu0 %v45_v28 }
  0x37   :  { %198 = vmatprep.subr.mxu0 %v60_v29 }
  0x38   :  { %199 = vmatpush3.msra.mxu0 %v44_v30 }
  0x39   :  { %200 = vmatprep.subr.mxu0 %v59_v31 }
  0x3a   :  { %201 = vmatpush3.msra.mxu0 %v43_v32 }
  0x3b   :  { %147 = vmatmul.mubr.f32.vlgmr.msra.gmra.mxu0 %v41_v33 }
  0xfb   :  { %v202_v34 = vpop.f32.mrf.mxu0 }
  0xfd   :  { %v203_v36 = vpop.f32.mrf.mxu0 }
  0xfe   :  { %v204_v37 = vadd.f32 %v203_v36, %v202_v34 }
 0x100   :  { %v149_v38 = vadd.f32 %v204_v37, %v169_v35 }
 0x102   :  { %152 = vst [vmem:[#allocation7] sm:$0xff] %v149_v38 }
 0x103   :  { %261 = shalt.err (!%p258_p0)
}
 0x104   :  { %162 = dma.vmem_to_hbm [thread:$0]  %s160_s25, 128, %s316_s3, [#allocation4]  }
 0x105   :  { %274 = dma.done.wait [#allocation4], 128  }
 0x106   :  { %275 = vsyncadd [#allocation4], 4294967168 }
 0x107   :  { %166 = vsyncpa [#allocation3], 1 }
 0x108   :  { %167 = vsyncpa [#allocation6], 1 }
 0x109   :  { %168 = vsyncpa [#allocation4], 1 }

</bundles_post_ra>
